<compile_context>
chip_gen: v7x
topology: tpu7x:2x2x1
jax: 0.10.0
libtpu: 0.0.40
codegen_flags: <defaults>
</compile_context>

<pallas_src>
import functools

import jax
import jax.numpy as jnp
from jax import lax
from jax.experimental import pallas as pl
from jax.experimental.pallas import tpu as pltpu


# ----------------------------- Pallas kernel ------------------------------ #

def _avsl_body(e1_ref, e2_ref, c1_ref, c2_ref, w_ref, alpha_ref, beta_ref,
               out_ref, *, n_layers, p):
    """Computes one (tb1, tb2) tile of the AVSL 'ovr_sim' matrix.

    e1/e2 blocks are already p-normalized in the wrapper.  c1/c2/w/alpha/beta
    contain only layers 1..L-1.
    """
    tb1, d = e1_ref.shape[1], e1_ref.shape[2]
    tb2 = e2_ref.shape[1]

    nodes_hat = None
    for l in range(n_layers):
        e1 = e1_ref[l].astype(jnp.float32)                       # (tb1, D)
        e2 = e2_ref[l].astype(jnp.float32)                       # (tb2, D)
        diff = e1[:, None, :] - e2[None, :, :]                   # (tb1, tb2, D)
        if p == 2:
            nodes = diff * diff          # |x|^2 == x*x: no abs, no pow
        else:
            nodes = jnp.abs(diff) ** p

        if l == 0:
            nodes_hat = nodes
        else:
            c1 = c1_ref[l - 1].astype(jnp.float32)               # (tb1, D)
            c2 = c2_ref[l - 1].astype(jnp.float32)               # (tb2, D)
            eta = c1[:, None, :] * c2[None, :, :]                # (tb1, tb2, D)
            P = jax.nn.sigmoid(alpha_ref[l - 1] * eta + beta_ref[l - 1])
            # (nodes_hat @ W) on the MXU with f32 accumulation.
            prop = jnp.dot(nodes_hat.reshape(tb1 * tb2, d), w_ref[l - 1],
                           preferred_element_type=jnp.float32
                           ).reshape(tb1, tb2, d)
            # == (1-P)*prop + P*nodes, one fewer full-tensor multiply.
            nodes_hat = prop + P * (nodes - prop)

    out_ref[...] = jnp.sum(nodes_hat, axis=-1)                   # (tb1, tb2)


def _avsl_kernel(*refs, n_layers, p):
    _avsl_body(*refs, n_layers=n_layers, p=p)


def _avsl_kernel_tri(it_ref, jt_ref, *refs, n_layers, p):
    # The scalar-prefetched (i, j) tile tables are only used by the index_maps.
    del it_ref, jt_ref
    _avsl_body(*refs, n_layers=n_layers, p=p)


# ------------------------------ JAX glue ----------------------------------- #

def _round_up(x, m):
    return ((x + m - 1) // m) * m


def _pad_rows(x, new_size):
    pad = new_size - x.shape[1]
    if pad == 0:
        return x
    return jnp.pad(x, ((0, 0), (0, pad), (0, 0)))


def _p_normalize(x, p, eps=1e-12):
    """F.normalize(x, p, dim=-1): x / max(||x||_p, eps). Keeps input dtype."""
    x32 = x.astype(jnp.float32)
    if p == 2:
        n = jnp.sqrt(jnp.sum(x32 * x32, axis=-1, keepdims=True))
    else:
        n = jnp.sum(jnp.abs(x32) ** p, axis=-1, keepdims=True) ** (1.0 / p)
    return (x32 / jnp.maximum(n, eps)).astype(x.dtype)


def topk_mask(w, k, axis=0):
    """Binary mask of the top-k entries of `w` along `axis`."""
    wm = jnp.moveaxis(w, axis, -1)
    _, idx = lax.top_k(wm, k)                                    # (..., k)
    mask = jnp.sum(jax.nn.one_hot(idx, wm.shape[-1], dtype=w.dtype), axis=-2)
    return jnp.moveaxis(mask, -1, axis)


def preprocess_links(links, k=3):
    """W *= topk_mask(W, k, dim=0); W /= (sum(W, dim=0, keepdim=True) + 1e-8)."""
    def f(w):
        w = w * topk_mask(w, k, axis=0)
        return w / (jnp.sum(w, axis=0, keepdims=True) + 1e-8)
    return jnp.stack([f(w) for w in links], axis=0)              # (L-1, D, D)


def avsl_similarity_eval(embed_list, certainty_list, links, alpha, beta,
                         embed_list2=None, certainty_list2=None,
                         *, p=2, tb1=None, tb2=None):
    """Eval-mode forward of AVSL_Similarity: returns the (B1, B2) 'ovr_sim'."""
    L = len(embed_list)
    D = embed_list[0].shape[-1]

    symmetric = embed_list2 is None
    # Normalization hoisted out of the kernel (otherwise each row block would
    # be re-normalized once per tile along the other grid axis).
    e1 = jnp.stack([_p_normalize(e, p) for e in embed_list], axis=0)      # (L,B1,D)
    c1 = jnp.stack(certainty_list, axis=0)                                # (L,B1,D)
    if symmetric:
        e2, c2 = e1, c1
    else:
        e2 = jnp.stack([_p_normalize(e, p) for e in embed_list2], axis=0)
        c2 = jnp.stack(certainty_list2 if certainty_list2 is not None
                       else certainty_list, axis=0)
    B1, B2 = e1.shape[1], e2.shape[1]

    # Layer-0 certainties / alpha / beta are never read in the kernel: slice
    # them away -> less HBM->VMEM traffic and smaller per-tile buffers.
    if L > 1:
        w = preprocess_links(links, k=3).astype(jnp.float32)              # (L-1,D,D)
        c1_in, c2_in = c1[1:], c2[1:]
        alpha_in = jnp.asarray(alpha, jnp.float32).reshape(L, 1, D)[1:]
        beta_in = jnp.asarray(beta, jnp.float32).reshape(L, 1, D)[1:]
    else:
        w = jnp.zeros((1, D, D), jnp.float32)
        c1_in = jnp.zeros((1, B1, D), c1.dtype)
        c2_in = jnp.zeros((1, B2, D), c2.dtype)
        alpha_in = jnp.zeros((1, 1, D), jnp.float32)
        beta_in = jnp.zeros((1, 1, D), jnp.float32)
    Lm1 = w.shape[0]

    vmem_limit = 64 * 1024 * 1024   # stays within v7x's 64 MiB physical VMEM

    if symmetric and tb1 is None and tb2 is None:
        # ovr_sim(i,j) == ovr_sim(j,i) when comparing the batch with itself:
        # compute only tiles with tile_i <= tile_j (1-D grid over a scalar-
        # prefetched (i, j) tile table) and mirror the lower half in JAX.
        tb = 128 if B1 >= 128 else _round_up(max(B1, 1), 8)
        Bp = _round_up(B1, tb)
        nt = Bp // tb
        e1p = _pad_rows(e1, Bp)
        c1p = _pad_rows(c1_in, Bp)
        pairs = [(i, j) for i in range(nt) for j in range(i, nt)]
        it = jnp.asarray([i for i, _ in pairs], jnp.int32)
        jt = jnp.asarray([j for _, j in pairs], jnp.int32)

        kernel = functools.partial(_avsl_kernel_tri, n_layers=L, p=p)
        raw = pl.pallas_call(
            kernel,
            out_shape=jax.ShapeDtypeStruct((Bp, Bp), jnp.float32),
            grid_spec=pltpu.PrefetchScalarGridSpec(
                num_scalar_prefetch=2,
                grid=(len(pairs),),
                in_specs=[
                    pl.BlockSpec((L, tb, D), lambda t, it, jt: (0, it[t], 0)),
                    pl.BlockSpec((L, tb, D), lambda t, it, jt: (0, jt[t], 0)),
                    pl.BlockSpec((Lm1, tb, D), lambda t, it, jt: (0, it[t], 0)),
                    pl.BlockSpec((Lm1, tb, D), lambda t, it, jt: (0, jt[t], 0)),
                    pl.BlockSpec((Lm1, D, D), lambda t, it, jt: (0, 0, 0)),
                    pl.BlockSpec((Lm1, 1, D), lambda t, it, jt: (0, 0, 0)),
                    pl.BlockSpec((Lm1, 1, D), lambda t, it, jt: (0, 0, 0)),
                ],
                out_specs=pl.BlockSpec((tb, tb),
                                       lambda t, it, jt: (it[t], jt[t])),
            ),
            compiler_params=pltpu.CompilerParams(
                # TODO(synk): switch to "parallel" (v7x 2-TC sharding) once
                # data-dependent output index_maps are verified safe with it.
                dimension_semantics=("arbitrary",),
                vmem_limit_bytes=vmem_limit),
        )(it, jt, e1p, e1p, c1p, c1p, w, alpha_in, beta_in)

        tile_idx = jnp.arange(Bp, dtype=jnp.int32) // tb
        upper = tile_idx[:, None] <= tile_idx[None, :]
        full = jnp.where(upper, raw, raw.T)        # mirror the lower triangle
        return full[:B1, :B2]

    # General (rectangular) path: full (i, j) grid with padding for ragged B.
    tb1 = (128 if B1 >= 128 else _round_up(max(B1, 1), 8)) if tb1 is None else tb1
    tb2 = (128 if B2 >= 128 else _round_up(max(B2, 1), 8)) if tb2 is None else tb2
    B1p, B2p = _round_up(B1, tb1), _round_up(B2, tb2)
    e1p, e2p = _pad_rows(e1, B1p), _pad_rows(e2, B2p)
    c1p, c2p = _pad_rows(c1_in, B1p), _pad_rows(c2_in, B2p)
    grid = (B1p // tb1, B2p // tb2)

    kernel = functools.partial(_avsl_kernel, n_layers=L, p=p)
    raw = pl.pallas_call(
        kernel,
        out_shape=jax.ShapeDtypeStruct((B1p, B2p), jnp.float32),
        grid_spec=pl.GridSpec(
            grid=grid,
            in_specs=[
                pl.BlockSpec((L, tb1, D), lambda i, j: (0, i, 0)),    # embed1
                pl.BlockSpec((L, tb2, D), lambda i, j: (0, j, 0)),    # embed2
                pl.BlockSpec((Lm1, tb1, D), lambda i, j: (0, i, 0)),  # cert1 (l>=1)
                pl.BlockSpec((Lm1, tb2, D), lambda i, j: (0, j, 0)),  # cert2 (l>=1)
                pl.BlockSpec((Lm1, D, D), lambda i, j: (0, 0, 0)),    # links
                pl.BlockSpec((Lm1, 1, D), lambda i, j: (0, 0, 0)),    # alpha (l>=1)
                pl.BlockSpec((Lm1, 1, D), lambda i, j: (0, 0, 0)),    # beta  (l>=1)
            ],
            out_specs=pl.BlockSpec((tb1, tb2), lambda i, j: (i, j)),
        ),
        compiler_params=pltpu.CompilerParams(
            dimension_semantics=("parallel", "parallel"),
            vmem_limit_bytes=vmem_limit),
    )(e1p, e2p, c1p, c2p, w, alpha_in, beta_in)
    return raw[:B1, :B2]


# Pure-JAX reference (mirrors get_matrix_similarity, eval path).
def avsl_ref(embed_list, certainty_list, links, alpha, beta, p=2,
             embed_list2=None, certainty_list2=None):
    if embed_list2 is None:
        embed_list2, certainty_list2 = embed_list, certainty_list
    L = len(embed_list)
    w_all = preprocess_links(links, 3) if L > 1 else None
    alpha = jnp.asarray(alpha, jnp.float32).reshape(L, -1)
    beta = jnp.asarray(beta, jnp.float32).reshape(L, -1)
    nodes_hat = None
    for l in range(L):
        e1 = _p_normalize(embed_list[l].astype(jnp.float32), p)
        e2 = _p_normalize(embed_list2[l].astype(jnp.float32), p)
        nodes = jnp.abs(e1[:, None, :] - e2[None, :, :]) ** p
        if l == 0:
            nodes_hat = nodes
        else:
            c1 = certainty_list[l].astype(jnp.float32)
            c2 = certainty_list2[l].astype(jnp.float32)
            eta = c1[:, None, :] * c2[None, :, :]
            P = jax.nn.sigmoid(alpha[l] * eta + beta[l])
            nodes_hat = (1 - P) * (nodes_hat @ w_all[l - 1]) + P * nodes
    return jnp.sum(nodes_hat, axis=-1)


# --------------------------------- main ------------------------------------ #

if __name__ == "__main__":
    # Module defaults: embed_dim=128, n_layers=3 (3 output_channels), p=2.
    L, B, D, p = 3, 8, 128, 2

    key = jax.random.PRNGKey(0)
    keys = jax.random.split(key, 2 * L + (L - 1) + 1)

    embed_list = [jax.random.normal(keys[l], (B, D), jnp.float32) for l in range(L)]
    certainty_list = [jax.random.uniform(keys[L + l], (B, D), jnp.float32)
                      for l in range(L)]
    links = [jnp.abs(jax.random.normal(keys[2 * L + l], (D, D), jnp.float32))
             for l in range(L - 1)]
    # init_parameters(): alpha_l = ones(d), beta_l = zeros(d)
    alpha = jnp.ones((L, D), jnp.float32)
    beta = jnp.zeros((L, D), jnp.float32)

    # Eval path 1: self-similarity (embed_list2=None) -> symmetric/triangular grid.
    out = jax.block_until_ready(
        avsl_similarity_eval(embed_list, certainty_list, links, alpha, beta, p=p))
    ref = avsl_ref(embed_list, certainty_list, links, alpha, beta, p=p)
    assert out.shape == (B, B)
    assert jnp.allclose(out, ref, rtol=1e-4, atol=1e-4), "self-sim mismatch"

    # Eval path 2: explicit second batch -> rectangular grid with padding.
    B2 = 20
    k2 = jax.random.split(keys[-1], 2 * L)
    embed_list2 = [jax.random.normal(k2[l], (B2, D), jnp.float32) for l in range(L)]
    certainty_list2 = [jax.random.uniform(k2[L + l], (B2, D), jnp.float32)
                       for l in range(L)]
    out2 = jax.block_until_ready(
        avsl_similarity_eval(embed_list, certainty_list, links, alpha, beta,
                             embed_list2=embed_list2,
                             certainty_list2=certainty_list2, p=p))
    ref2 = avsl_ref(embed_list, certainty_list, links, alpha, beta, p=p,
                    embed_list2=embed_list2, certainty_list2=certainty_list2)
    assert out2.shape == (B, B2)
    assert jnp.allclose(out2, ref2, rtol=1e-4, atol=1e-4), "cross-sim mismatch"

    print("KERNEL_OK")
</pallas_src>

<mosaic_0001>
module attributes {stable_mosaic.version = 11 : i64} {
  func.func @_avsl_kernel_tri(%arg0: i32, %arg1: memref<1xi32, #tpu.memory_space<smem>>, %arg2: memref<1xi32, #tpu.memory_space<smem>>, %arg3: memref<3x8x128xf32, #tpu.memory_space<vmem>>, %arg4: memref<3x8x128xf32, #tpu.memory_space<vmem>>, %arg5: memref<2x8x128xf32, #tpu.memory_space<vmem>>, %arg6: memref<2x8x128xf32, #tpu.memory_space<vmem>>, %arg7: memref<2x128x128xf32, #tpu.memory_space<vmem>>, %arg8: memref<2x1x128xf32, #tpu.memory_space<vmem>>, %arg9: memref<2x1x128xf32, #tpu.memory_space<vmem>>, %arg10: memref<8x8xf32, #tpu.memory_space<vmem>>) attributes {dimension_semantics = [#tpu.dimension_semantics<arbitrary>], iteration_bounds = array<i64: 1>, scalar_prefetch = 2 : i64, scratch_operands = 0 : i64, tpu.core_type = #tpu.core_type<tc>, window_params = [{transform_indices = @transform_0, window_bounds = array<i64: 3, 8, 128>}, {transform_indices = @transform_1, window_bounds = array<i64: 3, 8, 128>}, {transform_indices = @transform_2, window_bounds = array<i64: 2, 8, 128>}, {transform_indices = @transform_3, window_bounds = array<i64: 2, 8, 128>}, {pipeline_mode = #tpu.pipeline_mode<synchronous>, transform_indices = @transform_4, window_bounds = array<i64: 2, 128, 128>}, {pipeline_mode = #tpu.pipeline_mode<synchronous>, transform_indices = @transform_5, window_bounds = array<i64: 2, 1, 128>}, {pipeline_mode = #tpu.pipeline_mode<synchronous>, transform_indices = @transform_6, window_bounds = array<i64: 2, 1, 128>}, {transform_indices = @transform_7, window_bounds = array<i64: 8, 8>}]} {
    %c0 = arith.constant 0 : index
    %c0_0 = arith.constant 0 : index
    %c0_1 = arith.constant 0 : index
    %0 = vector.load %arg3[%c0, %c0_0, %c0_1] : memref<3x8x128xf32, #tpu.memory_space<vmem>>, vector<1x8x128xf32>
    %1 = vector.shape_cast %0 : vector<1x8x128xf32> to vector<8x128xf32>
    %c0_2 = arith.constant 0 : index
    %c0_3 = arith.constant 0 : index
    %c0_4 = arith.constant 0 : index
    %2 = vector.load %arg4[%c0_2, %c0_3, %c0_4] : memref<3x8x128xf32, #tpu.memory_space<vmem>>, vector<1x8x128xf32>
    %3 = vector.shape_cast %2 : vector<1x8x128xf32> to vector<8x128xf32>
    %4 = vector.shape_cast %1 : vector<8x128xf32> to vector<8x1x128xf32>
    %5 = vector.shape_cast %3 : vector<8x128xf32> to vector<1x8x128xf32>
    %6 = vector.broadcast %4 : vector<8x1x128xf32> to vector<8x8x128xf32>
    %7 = vector.broadcast %5 : vector<1x8x128xf32> to vector<8x8x128xf32>
    %8 = arith.subf %6, %7 : vector<8x8x128xf32>
    %9 = arith.mulf %8, %8 : vector<8x8x128xf32>
    %c1 = arith.constant 1 : index
    %c0_5 = arith.constant 0 : index
    %c0_6 = arith.constant 0 : index
    %10 = vector.load %arg3[%c1, %c0_5, %c0_6] : memref<3x8x128xf32, #tpu.memory_space<vmem>>, vector<1x8x128xf32>
    %11 = vector.shape_cast %10 : vector<1x8x128xf32> to vector<8x128xf32>
    %c1_7 = arith.constant 1 : index
    %c0_8 = arith.constant 0 : index
    %c0_9 = arith.constant 0 : index
    %12 = vector.load %arg4[%c1_7, %c0_8, %c0_9] : memref<3x8x128xf32, #tpu.memory_space<vmem>>, vector<1x8x128xf32>
    %13 = vector.shape_cast %12 : vector<1x8x128xf32> to vector<8x128xf32>
    %14 = vector.shape_cast %11 : vector<8x128xf32> to vector<8x1x128xf32>
    %15 = vector.shape_cast %13 : vector<8x128xf32> to vector<1x8x128xf32>
    %16 = vector.broadcast %14 : vector<8x1x128xf32> to vector<8x8x128xf32>
    %17 = vector.broadcast %15 : vector<1x8x128xf32> to vector<8x8x128xf32>
    %18 = arith.subf %16, %17 : vector<8x8x128xf32>
    %19 = arith.mulf %18, %18 : vector<8x8x128xf32>
    %c0_10 = arith.constant 0 : index
    %c0_11 = arith.constant 0 : index
    %c0_12 = arith.constant 0 : index
    %20 = vector.load %arg5[%c0_10, %c0_11, %c0_12] : memref<2x8x128xf32, #tpu.memory_space<vmem>>, vector<1x8x128xf32>
    %21 = vector.shape_cast %20 : vector<1x8x128xf32> to vector<8x128xf32>
    %c0_13 = arith.constant 0 : index
    %c0_14 = arith.constant 0 : index
    %c0_15 = arith.constant 0 : index
    %22 = vector.load %arg6[%c0_13, %c0_14, %c0_15] : memref<2x8x128xf32, #tpu.memory_space<vmem>>, vector<1x8x128xf32>
    %23 = vector.shape_cast %22 : vector<1x8x128xf32> to vector<8x128xf32>
    %24 = vector.shape_cast %21 : vector<8x128xf32> to vector<8x1x128xf32>
    %25 = vector.shape_cast %23 : vector<8x128xf32> to vector<1x8x128xf32>
    %26 = vector.broadcast %24 : vector<8x1x128xf32> to vector<8x8x128xf32>
    %27 = vector.broadcast %25 : vector<1x8x128xf32> to vector<8x8x128xf32>
    %28 = arith.mulf %26, %27 : vector<8x8x128xf32>
    %c0_16 = arith.constant 0 : index
    %c0_17 = arith.constant 0 : index
    %c0_18 = arith.constant 0 : index
    %29 = vector.load %arg8[%c0_16, %c0_17, %c0_18] : memref<2x1x128xf32, #tpu.memory_space<vmem>>, vector<1x1x128xf32>
    %30 = vector.shape_cast %29 : vector<1x1x128xf32> to vector<1x128xf32>
    %31 = vector.shape_cast %30 : vector<1x128xf32> to vector<1x1x128xf32>
    %32 = vector.broadcast %31 : vector<1x1x128xf32> to vector<8x8x128xf32>
    %33 = arith.mulf %32, %28 : vector<8x8x128xf32>
    %c0_19 = arith.constant 0 : index
    %c0_20 = arith.constant 0 : index
    %c0_21 = arith.constant 0 : index
    %34 = vector.load %arg9[%c0_19, %c0_20, %c0_21] : memref<2x1x128xf32, #tpu.memory_space<vmem>>, vector<1x1x128xf32>
    %35 = vector.shape_cast %34 : vector<1x1x128xf32> to vector<1x128xf32>
    %36 = vector.shape_cast %35 : vector<1x128xf32> to vector<1x1x128xf32>
    %37 = vector.broadcast %36 : vector<1x1x128xf32> to vector<8x8x128xf32>
    %38 = arith.addf %33, %37 : vector<8x8x128xf32>
    %39 = arith.negf %38 : vector<8x8x128xf32>
    %40 = math.exp %39 : vector<8x8x128xf32>
    %cst = arith.constant 1.000000e+00 : f32
    %41 = vector.broadcast %cst : f32 to vector<8x8x128xf32>
    %42 = arith.addf %41, %40 : vector<8x8x128xf32>
    %43 = arith.divf %41, %42 : vector<8x8x128xf32>
    %44 = vector.shape_cast %9 : vector<8x8x128xf32> to vector<64x128xf32>
    %c0_22 = arith.constant 0 : index
    %c0_23 = arith.constant 0 : index
    %c0_24 = arith.constant 0 : index
    %45 = vector.load %arg7[%c0_22, %c0_23, %c0_24] : memref<2x128x128xf32, #tpu.memory_space<vmem>>, vector<1x128x128xf32>
    %46 = vector.shape_cast %45 : vector<1x128x128xf32> to vector<128x128xf32>
    %cst_25 = arith.constant dense<0.000000e+00> : vector<64x128xf32>
    %47 = tpu.matmul %44, %46, %cst_25 {dimension_numbers = #tpu.dot_dimension_numbers<[1], [0], [0], [1], [0, 0, 1, 1], [], []>} : vector<64x128xf32>, vector<128x128xf32>, vector<64x128xf32> -> vector<64x128xf32>
    %48 = vector.shape_cast %47 : vector<64x128xf32> to vector<8x8x128xf32>
    %49 = arith.subf %19, %48 : vector<8x8x128xf32>
    %50 = arith.mulf %43, %49 : vector<8x8x128xf32>
    %51 = arith.addf %48, %50 : vector<8x8x128xf32>
    %c2 = arith.constant 2 : index
    %c0_26 = arith.constant 0 : index
    %c0_27 = arith.constant 0 : index
    %52 = vector.load %arg3[%c2, %c0_26, %c0_27] : memref<3x8x128xf32, #tpu.memory_space<vmem>>, vector<1x8x128xf32>
    %53 = vector.shape_cast %52 : vector<1x8x128xf32> to vector<8x128xf32>
    %c2_28 = arith.constant 2 : index
    %c0_29 = arith.constant 0 : index
    %c0_30 = arith.constant 0 : index
    %54 = vector.load %arg4[%c2_28, %c0_29, %c0_30] : memref<3x8x128xf32, #tpu.memory_space<vmem>>, vector<1x8x128xf32>
    %55 = vector.shape_cast %54 : vector<1x8x128xf32> to vector<8x128xf32>
    %56 = vector.shape_cast %53 : vector<8x128xf32> to vector<8x1x128xf32>
    %57 = vector.shape_cast %55 : vector<8x128xf32> to vector<1x8x128xf32>
    %58 = vector.broadcast %56 : vector<8x1x128xf32> to vector<8x8x128xf32>
    %59 = vector.broadcast %57 : vector<1x8x128xf32> to vector<8x8x128xf32>
    %60 = arith.subf %58, %59 : vector<8x8x128xf32>
    %61 = arith.mulf %60, %60 : vector<8x8x128xf32>
    %c1_31 = arith.constant 1 : index
    %c0_32 = arith.constant 0 : index
    %c0_33 = arith.constant 0 : index
    %62 = vector.load %arg5[%c1_31, %c0_32, %c0_33] : memref<2x8x128xf32, #tpu.memory_space<vmem>>, vector<1x8x128xf32>
    %63 = vector.shape_cast %62 : vector<1x8x128xf32> to vector<8x128xf32>
    %c1_34 = arith.constant 1 : index
    %c0_35 = arith.constant 0 : index
    %c0_36 = arith.constant 0 : index
    %64 = vector.load %arg6[%c1_34, %c0_35, %c0_36] : memref<2x8x128xf32, #tpu.memory_space<vmem>>, vector<1x8x128xf32>
    %65 = vector.shape_cast %64 : vector<1x8x128xf32> to vector<8x128xf32>
    %66 = vector.shape_cast %63 : vector<8x128xf32> to vector<8x1x128xf32>
    %67 = vector.shape_cast %65 : vector<8x128xf32> to vector<1x8x128xf32>
    %68 = vector.broadcast %66 : vector<8x1x128xf32> to vector<8x8x128xf32>
    %69 = vector.broadcast %67 : vector<1x8x128xf32> to vector<8x8x128xf32>
    %70 = arith.mulf %68, %69 : vector<8x8x128xf32>
    %c1_37 = arith.constant 1 : index
    %c0_38 = arith.constant 0 : index
    %c0_39 = arith.constant 0 : index
    %71 = vector.load %arg8[%c1_37, %c0_38, %c0_39] : memref<2x1x128xf32, #tpu.memory_space<vmem>>, vector<1x1x128xf32>
    %72 = vector.shape_cast %71 : vector<1x1x128xf32> to vector<1x128xf32>
    %73 = vector.shape_cast %72 : vector<1x128xf32> to vector<1x1x128xf32>
    %74 = vector.broadcast %73 : vector<1x1x128xf32> to vector<8x8x128xf32>
    %75 = arith.mulf %74, %70 : vector<8x8x128xf32>
    %c1_40 = arith.constant 1 : index
    %c0_41 = arith.constant 0 : index
    %c0_42 = arith.constant 0 : index
    %76 = vector.load %arg9[%c1_40, %c0_41, %c0_42] : memref<2x1x128xf32, #tpu.memory_space<vmem>>, vector<1x1x128xf32>
    %77 = vector.shape_cast %76 : vector<1x1x128xf32> to vector<1x128xf32>
    %78 = vector.shape_cast %77 : vector<1x128xf32> to vector<1x1x128xf32>
    %79 = vector.broadcast %78 : vector<1x1x128xf32> to vector<8x8x128xf32>
    %80 = arith.addf %75, %79 : vector<8x8x128xf32>
    %81 = arith.negf %80 : vector<8x8x128xf32>
    %82 = math.exp %81 : vector<8x8x128xf32>
    %cst_43 = arith.constant 1.000000e+00 : f32
    %83 = vector.broadcast %cst_43 : f32 to vector<8x8x128xf32>
    %84 = arith.addf %83, %82 : vector<8x8x128xf32>
    %85 = arith.divf %83, %84 : vector<8x8x128xf32>
    %86 = vector.shape_cast %51 : vector<8x8x128xf32> to vector<64x128xf32>
    %c1_44 = arith.constant 1 : index
    %c0_45 = arith.constant 0 : index
    %c0_46 = arith.constant 0 : index
    %87 = vector.load %arg7[%c1_44, %c0_45, %c0_46] : memref<2x128x128xf32, #tpu.memory_space<vmem>>, vector<1x128x128xf32>
    %88 = vector.shape_cast %87 : vector<1x128x128xf32> to vector<128x128xf32>
    %cst_47 = arith.constant dense<0.000000e+00> : vector<64x128xf32>
    %89 = tpu.matmul %86, %88, %cst_47 {dimension_numbers = #tpu.dot_dimension_numbers<[1], [0], [0], [1], [0, 0, 1, 1], [], []>} : vector<64x128xf32>, vector<128x128xf32>, vector<64x128xf32> -> vector<64x128xf32>
    %90 = vector.shape_cast %89 : vector<64x128xf32> to vector<8x8x128xf32>
    %91 = arith.subf %61, %90 : vector<8x8x128xf32>
    %92 = arith.mulf %85, %91 : vector<8x8x128xf32>
    %93 = arith.addf %90, %92 : vector<8x8x128xf32>
    %cst_48 = arith.constant dense<0.000000e+00> : vector<8x8xf32>
    %94 = vector.multi_reduction <add>, %93, %cst_48 [2] : vector<8x8x128xf32> to vector<8x8xf32>
    %c0_49 = arith.constant 0 : index
    %c0_50 = arith.constant 0 : index
    %95 = vector.load %arg10[%c0_49, %c0_50] : memref<8x8xf32, #tpu.memory_space<vmem>>, vector<8x8xf32>
    tpu.vector_store %arg10[%c0_49, %c0_50], %94 {strides = array<i32>} : memref<8x8xf32, #tpu.memory_space<vmem>>, vector<8x8xf32>,
    return
  }
  func.func @transform_0(%arg0: i32, %arg1: memref<1xi32, #tpu.memory_space<smem>>, %arg2: memref<1xi32, #tpu.memory_space<smem>>) -> (i32, i32, i32) {
    %0 = arith.index_cast %arg0 : i32 to index
    %1 = memref.load %arg1[%0] : memref<1xi32, #tpu.memory_space<smem>>
    %c0_i32 = arith.constant 0 : i32
    %c0_i32_0 = arith.constant 0 : i32
    %c0_i32_1 = arith.constant 0 : i32
    return %c0_i32, %1, %c0_i32_0 : i32, i32, i32
  }
  func.func @transform_1(%arg0: i32, %arg1: memref<1xi32, #tpu.memory_space<smem>>, %arg2: memref<1xi32, #tpu.memory_space<smem>>) -> (i32, i32, i32) {
    %0 = arith.index_cast %arg0 : i32 to index
    %1 = memref.load %arg2[%0] : memref<1xi32, #tpu.memory_space<smem>>
    %c0_i32 = arith.constant 0 : i32
    %c0_i32_0 = arith.constant 0 : i32
    %c0_i32_1 = arith.constant 0 : i32
    return %c0_i32, %1, %c0_i32_0 : i32, i32, i32
  }
  func.func @transform_2(%arg0: i32, %arg1: memref<1xi32, #tpu.memory_space<smem>>, %arg2: memref<1xi32, #tpu.memory_space<smem>>) -> (i32, i32, i32) {
    %0 = arith.index_cast %arg0 : i32 to index
    %1 = memref.load %arg1[%0] : memref<1xi32, #tpu.memory_space<smem>>
    %c0_i32 = arith.constant 0 : i32
    %c0_i32_0 = arith.constant 0 : i32
    %c0_i32_1 = arith.constant 0 : i32
    return %c0_i32, %1, %c0_i32_0 : i32, i32, i32
  }
  func.func @transform_3(%arg0: i32, %arg1: memref<1xi32, #tpu.memory_space<smem>>, %arg2: memref<1xi32, #tpu.memory_space<smem>>) -> (i32, i32, i32) {
    %0 = arith.index_cast %arg0 : i32 to index
    %1 = memref.load %arg2[%0] : memref<1xi32, #tpu.memory_space<smem>>
    %c0_i32 = arith.constant 0 : i32
    %c0_i32_0 = arith.constant 0 : i32
    %c0_i32_1 = arith.constant 0 : i32
    return %c0_i32, %1, %c0_i32_0 : i32, i32, i32
  }
  func.func @transform_4(%arg0: i32, %arg1: memref<1xi32, #tpu.memory_space<smem>>, %arg2: memref<1xi32, #tpu.memory_space<smem>>) -> (i32, i32, i32) {
    %c0_i32 = arith.constant 0 : i32
    %c0_i32_0 = arith.constant 0 : i32
    %c0_i32_1 = arith.constant 0 : i32
    %c0_i32_2 = arith.constant 0 : i32
    return %c0_i32, %c0_i32_0, %c0_i32_1 : i32, i32, i32
  }
  func.func @transform_5(%arg0: i32, %arg1: memref<1xi32, #tpu.memory_space<smem>>, %arg2: memref<1xi32, #tpu.memory_space<smem>>) -> (i32, i32, i32) {
    %c0_i32 = arith.constant 0 : i32
    %c0_i32_0 = arith.constant 0 : i32
    %c0_i32_1 = arith.constant 0 : i32
    %c0_i32_2 = arith.constant 0 : i32
    return %c0_i32, %c0_i32_0, %c0_i32_1 : i32, i32, i32
  }
  func.func @transform_6(%arg0: i32, %arg1: memref<1xi32, #tpu.memory_space<smem>>, %arg2: memref<1xi32, #tpu.memory_space<smem>>) -> (i32, i32, i32) {
    %c0_i32 = arith.constant 0 : i32
    %c0_i32_0 = arith.constant 0 : i32
    %c0_i32_1 = arith.constant 0 : i32
    %c0_i32_2 = arith.constant 0 : i32
    return %c0_i32, %c0_i32_0, %c0_i32_1 : i32, i32, i32
  }
  func.func @transform_7(%arg0: i32, %arg1: memref<1xi32, #tpu.memory_space<smem>>, %arg2: memref<1xi32, #tpu.memory_space<smem>>) -> (i32, i32) {
    %0 = arith.index_cast %arg0 : i32 to index
    %1 = memref.load %arg1[%0] : memref<1xi32, #tpu.memory_space<smem>>
    %2 = arith.index_cast %arg0 : i32 to index
    %3 = memref.load %arg2[%2] : memref<1xi32, #tpu.memory_space<smem>>
    %c0_i32 = arith.constant 0 : i32
    return %1, %3 : i32, i32
  }
}

</mosaic_0001>

<bundles_post_ra>
// kernel: tpu_custom_call.1
= control target key start
LH: loop header
LB: loop body
LE: loop exit
PB: predicated region body
PF: predicated region fallthrough
CT: control target
= control target key end

     0   :  { %16 = vsyncpa [#allocation6], 0  ;;  %s2031_s0 = inlined_call_operand.<no memory space> [shape: s32[1], index: 0, kind: input, shape index: {}]   ;;  %s2032_s1 = inlined_call_operand.<no memory space> [shape: s32[1], index: 1, kind: input, shape index: {}]   ;;  %s2033_s2 = inlined_call_operand.hbm [shape: f32[3,8,128], index: 2, kind: input, shape index: {}]   ;;  %s2034_s3 = inlined_call_operand.hbm [shape: f32[3,8,128], index: 3, kind: input, shape index: {}]   ;;  %s2035_s4 = inlined_call_operand.hbm [shape: f32[2,8,128], index: 4, kind: input, shape index: {}]   ;;  %s2036_s5 = inlined_call_operand.hbm [shape: f32[2,8,128], index: 5, kind: input, shape index: {}]   ;;  %s2037_s6 = inlined_call_operand.hbm [shape: f32[2,128,128], index: 6, kind: input, shape index: {}]   ;;  %s2038_s7 = inlined_call_operand.hbm [shape: f32[2,1,128], index: 7, kind: input, shape index: {}]   ;;  %s2039_s8 = inlined_call_operand.hbm [shape: f32[2,1,128], index: 8, kind: input, shape index: {}]   ;;  %s2040_s9 = inlined_call_operand.hbm [shape: f32[8,8], index: 9, kind: output, shape index: {}]  }
   0x1   :  { %17 = vsyncpa [#allocation9], 0 }
   0x2   :  { %18 = vsyncpa [#allocation12], 0 }
   0x3   :  { %19 = vsyncpa [#allocation15], 0 }
   0x4   :  { %20 = vsyncpa [#allocation7], 0  ;;  %s1233_s11 = sshll.u32 %s2032_s1, 7  ;;  %s1735_s15 = smov [#allocation8]  }
   0x5   :  { %s43_s14 = scalar_lea.hbm %s2034_s3, %s1233_s11  ;;  %s44_s16 = sshll.u32 %s1735_s15, 4  ;;  %s45_s16 = int_to_ptr.vmem [resolvable:$true] %s44_s16 }
   0x6   :  { %s1807_s19 = scalar_lea.hbm %s2036_s5, %s1233_s11  ;;  %s1539_s20 = scalar_lea.hbm %s43_s14, 384 }
   0x7   :  { %p1540_p0 = scmp.ne.s32.totalorder %s43_s14, %s1539_s20  ;;  %s1541_s23 = scalar_lea.hbm %s2034_s3, 384 }
   0x8   :  { %p1542_p1 = scmp.lt.u32.totalorder %s43_s14, %s2034_s3  ;;  %p1543_p2 = scmp.lt.u32.totalorder %s1541_s23, %s1539_s20 }
   0x9   :  { %p1545_p4 = scmp.lt.u32.totalorder %s1539_s20, %s43_s14 }
   0xa   :  { %p1544_p3 = por %p1543_p2, %p1542_p1 }
   0xc   :  { %p1546_p5 = por %p1545_p4, %p1544_p3 }
   0xe   :  { %p1547_p6 = pnand %p1546_p5, %p1540_p0 }
  0x10   :  { %1550 = shalt.err (!%p1547_p6)
}
  0x11   :  { %s1551_s26 = scalar_lea.vmem %s45_s16, 384  ;;  %p1556_p8 = scmp.lt.s32.totalorder %s45_s16, %s45_s16 }
  0x12   :  { %p1552_p7 = scmp.ne.s32.totalorder %s45_s16, %s1551_s26  ;;  %p1557_p9 = scmp.lt.s32.totalorder %s1551_s26, %s1551_s26 }
  0x14   :  { %p1558_p10 = por %p1557_p9, %p1556_p8 }
  0x16   :  { %p1559_p11 = pnand %p1558_p10, %p1552_p7 }
  0x18   :  { %1562 = shalt.err (!%p1559_p11)
}
  0x19   :  { %s1736_s27 = smov 128   ;;  %s1737_s28 = smov 8  }
  0x1a   :  { %50 = dma.hbm_to_vmem [thread:$0]  %s43_s14, 384, %s45_s16, [#allocation9], %s1736_s27, %s1736_s27, %s1737_s28  }
  0x1b   :  { %s1738_s3 = smov [#allocation11]   ;;  %s1739_s30 = smov [#allocation14]  }
  0x1c   :  { %s74_s29 = sshll.u32 %s1738_s3, 4  ;;  %s98_s10 = sshll.u32 %s1739_s30, 4  ;;  %s75_s29 = int_to_ptr.vmem [resolvable:$true] %s74_s29  ;;  %s1818_s10 = int_to_ptr.vmem [resolvable:$true] %s98_s10 }
  0x1d   :  { %s1563_s11 = scalar_lea.hbm %s1807_s19, 256  ;;  %s1565_s15 = scalar_lea.hbm %s2036_s5, 256 }
  0x1e   :  { %p1564_p12 = scmp.ne.s32.totalorder %s1807_s19, %s1563_s11  ;;  %p1566_p13 = scmp.lt.u32.totalorder %s1807_s19, %s2036_s5 }
  0x1f   :  { %p1567_p0 = scmp.lt.u32.totalorder %s1565_s15, %s1563_s11  ;;  %p1569_p2 = scmp.lt.u32.totalorder %s1563_s11, %s1807_s19 }
  0x21   :  { %p1568_p1 = por %p1567_p0, %p1566_p13 }
  0x23   :  { %p1570_p3 = por %p1569_p2, %p1568_p1 }
  0x25   :  { %p1571_p4 = pnand %p1570_p3, %p1564_p12 }
  0x27   :  { %1574 = shalt.err (!%p1571_p4)
}
  0x28   :  { %s1575_s14 = scalar_lea.vmem %s75_s29, 256  ;;  %p1580_p6 = scmp.lt.s32.totalorder %s75_s29, %s75_s29 }
  0x29   :  { %p1576_p5 = scmp.ne.s32.totalorder %s75_s29, %s1575_s14  ;;  %p1581_p7 = scmp.lt.s32.totalorder %s1575_s14, %s1575_s14 }
  0x2b   :  { %p1582_p8 = por %p1581_p7, %p1580_p6 }
  0x2d   :  { %p1583_p9 = pnand %p1582_p8, %p1576_p5 }
  0x2f   :  { %1586 = shalt.err (!%p1583_p9)
}
  0x30   :  { %80 = dma.hbm_to_vmem [thread:$0]  %s1807_s19, 256, %s75_s29, [#allocation12], %s1736_s27, %s1736_s27, %s1737_s28  }
  0x31   :  { %s1587_s20 = scalar_lea.hbm %s2038_s7, 32 }
  0x32   :  { %p1588_p10 = scmp.ne.s32.totalorder %s2038_s7, %s1587_s20  ;;  %p1591_p11 = scmp.lt.u32.totalorder %s1587_s20, %s2038_s7 }
  0x34   :  { %p1593_p12 = pnand %p1591_p11, %p1588_p10 }
  0x36   :  { %1596 = shalt.err (!%p1593_p12)
}
  0x37   :  { %s1597_s25 = scalar_lea.vmem %s1818_s10, 32  ;;  %p1602_p0 = scmp.lt.s32.totalorder %s1818_s10, %s1818_s10 }
  0x38   :  { %p1598_p13 = scmp.ne.s32.totalorder %s1818_s10, %s1597_s25  ;;  %p1603_p1 = scmp.lt.s32.totalorder %s1597_s25, %s1597_s25 }
  0x3a   :  { %p1604_p2 = por %p1603_p1, %p1602_p0 }
  0x3c   :  { %p1605_p3 = pnand %p1604_p2, %p1598_p13 }
  0x3e   :  { %1608 = shalt.err (!%p1605_p3)
}
  0x3f   :  { %s1740_s19 = smov 16   ;;  %s1741_s26 = smov 1  }
  0x40   :  { %104 = dma.hbm_to_vmem [thread:$0]  %s2038_s7, 32, %s1818_s10, [#allocation15], %s1740_s19, %s1740_s19, %s1741_s26  }
  0x41   :  { %s1232_s12 = sshll.u32 %s2031_s0, 7  ;;  %s1742_s18 = smov [#allocation5]  }
  0x42   :  { %s28_s17 = scalar_lea.hbm %s2033_s2, %s1232_s12  ;;  %s29_s14 = sshll.u32 %s1742_s18, 4  ;;  %s30_s14 = int_to_ptr.vmem [resolvable:$true] %s29_s14 }
  0x43   :  { %s1863_s20 = scalar_lea.hbm %s2035_s4, %s1232_s12  ;;  %s1609_s21 = scalar_lea.hbm %s28_s17, 384 }
  0x44   :  { %p1610_p4 = scmp.ne.s32.totalorder %s28_s17, %s1609_s21  ;;  %s1611_s10 = scalar_lea.hbm %s2033_s2, 384 }
  0x45   :  { %p1612_p5 = scmp.lt.u32.totalorder %s28_s17, %s2033_s2  ;;  %p1613_p6 = scmp.lt.u32.totalorder %s1611_s10, %s1609_s21 }
  0x46   :  { %p1615_p8 = scmp.lt.u32.totalorder %s1609_s21, %s28_s17 }
  0x47   :  { %p1614_p7 = por %p1613_p6, %p1612_p5 }
  0x49   :  { %p1616_p9 = por %p1615_p8, %p1614_p7 }
  0x4b   :  { %p1617_p10 = pnand %p1616_p9, %p1610_p4 }
  0x4d   :  { %1620 = shalt.err (!%p1617_p10)
}
  0x4e   :  { %s1621_s25 = scalar_lea.vmem %s30_s14, 384  ;;  %p1626_p12 = scmp.lt.s32.totalorder %s30_s14, %s30_s14 }
  0x4f   :  { %p1622_p11 = scmp.ne.s32.totalorder %s30_s14, %s1621_s25  ;;  %p1627_p13 = scmp.lt.s32.totalorder %s1621_s25, %s1621_s25 }
  0x51   :  { %p1628_p0 = por %p1627_p13, %p1626_p12 }
  0x53   :  { %p1629_p1 = pnand %p1628_p0, %p1622_p11 }
  0x55   :  { %1632 = shalt.err (!%p1629_p1)
}
  0x56   :  { %35 = dma.hbm_to_vmem [thread:$0]  %s28_s17, 384, %s30_s14, [#allocation6], %s1736_s27, %s1736_s27, %s1737_s28  }
  0x57   :  { %s1743_s2 = smov [#allocation10]   ;;  %s1744_s29 = smov [#allocation13]  }
  0x58   :  { %s59_s3 = sshll.u32 %s1743_s2, 4  ;;  %s86_s30 = sshll.u32 %s1744_s29, 4  ;;  %s60_s3 = int_to_ptr.vmem [resolvable:$true] %s59_s3  ;;  %s1874_s30 = int_to_ptr.vmem [resolvable:$true] %s86_s30 }
  0x59   :  { %s1633_s11 = scalar_lea.hbm %s1863_s20, 256  ;;  %s1635_s15 = scalar_lea.hbm %s2035_s4, 256 }
  0x5a   :  { %p1634_p2 = scmp.ne.s32.totalorder %s1863_s20, %s1633_s11  ;;  %p1636_p3 = scmp.lt.u32.totalorder %s1863_s20, %s2035_s4 }
  0x5b   :  { %p1637_p4 = scmp.lt.u32.totalorder %s1635_s15, %s1633_s11  ;;  %p1639_p6 = scmp.lt.u32.totalorder %s1633_s11, %s1863_s20 }
  0x5d   :  { %p1638_p5 = por %p1637_p4, %p1636_p3 }
  0x5f   :  { %p1640_p7 = por %p1639_p6, %p1638_p5 }
  0x61   :  { %p1641_p8 = pnand %p1640_p7, %p1634_p2 }
  0x63   :  { %1644 = shalt.err (!%p1641_p8)
}
  0x64   :  { %s1645_s17 = scalar_lea.vmem %s60_s3, 256  ;;  %p1650_p10 = scmp.lt.s32.totalorder %s60_s3, %s60_s3 }
  0x65   :  { %p1646_p9 = scmp.ne.s32.totalorder %s60_s3, %s1645_s17  ;;  %p1651_p11 = scmp.lt.s32.totalorder %s1645_s17, %s1645_s17 }
  0x67   :  { %p1652_p12 = por %p1651_p11, %p1650_p10 }
  0x69   :  { %p1653_p13 = pnand %p1652_p12, %p1646_p9 }
  0x6b   :  { %1656 = shalt.err (!%p1653_p13)
}
  0x6c   :  { %65 = dma.hbm_to_vmem [thread:$0]  %s1863_s20, 256, %s60_s3, [#allocation9], %s1736_s27, %s1736_s27, %s1737_s28  }
  0x6d   :  { %s1657_s5 = scalar_lea.hbm %s2037_s6, 4096 }
  0x6e   :  { %p1658_p0 = scmp.ne.s32.totalorder %s2037_s6, %s1657_s5  ;;  %p1661_p1 = scmp.lt.u32.totalorder %s1657_s5, %s2037_s6 }
  0x70   :  { %p1663_p2 = pnand %p1661_p1, %p1658_p0 }
  0x72   :  { %1666 = shalt.err (!%p1663_p2)
}
  0x73   :  { %s1667_s23 = scalar_lea.vmem %s1874_s30, 4096  ;;  %p1672_p4 = scmp.lt.s32.totalorder %s1874_s30, %s1874_s30 }
  0x74   :  { %p1668_p3 = scmp.ne.s32.totalorder %s1874_s30, %s1667_s23  ;;  %p1673_p5 = scmp.lt.s32.totalorder %s1667_s23, %s1667_s23 }
  0x76   :  { %p1674_p6 = por %p1673_p5, %p1672_p4 }
  0x78   :  { %p1675_p7 = pnand %p1674_p6, %p1668_p3 }
  0x7a   :  { %1678 = shalt.err (!%p1675_p7)
}
  0x7b   :  { %92 = dma.hbm_to_vmem [thread:$0]  %s2037_s6, 4096, %s1874_s30, [#allocation12], %s1736_s27, %s1736_s27, %s1737_s28  }
  0x7c   :  { %s1745_s25 = smov [#allocation16]   ;;  %s1679_s11 = scalar_lea.hbm %s2039_s8, 32 }
  0x7d   :  { %s110_s2 = sshll.u32 %s1745_s25, 4  ;;  %p1680_p8 = scmp.ne.s32.totalorder %s2039_s8, %s1679_s11  ;;  %s111_s2 = int_to_ptr.vmem [resolvable:$true] %s110_s2 }
  0x7e   :  { %p1683_p9 = scmp.lt.u32.totalorder %s1679_s11, %s2039_s8 }
  0x80   :  { %p1685_p10 = pnand %p1683_p9, %p1680_p8 }
  0x82   :  { %1688 = shalt.err (!%p1685_p10)
}
  0x83   :  { %s1689_s16 = scalar_lea.vmem %s111_s2, 32  ;;  %p1694_p12 = scmp.lt.s32.totalorder %s111_s2, %s111_s2 }
  0x84   :  { %p1690_p11 = scmp.ne.s32.totalorder %s111_s2, %s1689_s16  ;;  %p1695_p13 = scmp.lt.s32.totalorder %s1689_s16, %s1689_s16 }
  0x86   :  { %p1696_p0 = por %p1695_p13, %p1694_p12 }
  0x88   :  { %p1697_p1 = pnand %p1696_p0, %p1690_p11 }
  0x8a   :  { %1700 = shalt.err (!%p1697_p1)
}
  0x8b   :  { %116 = dma.hbm_to_vmem [thread:$0]  %s2039_s8, 32, %s111_s2, [#allocation15], %s1740_s19, %s1740_s19, %s1741_s26  }
  0x8c   :  { %1725 = dma.done.wait [#allocation6], 384  }
  0x8d   :  { %1726 = vsyncadd [#allocation6], 4294966912 }
  0x8e   :  { %1727 = dma.done.wait [#allocation9], 640  }
  0x8f   :  { %1728 = vsyncadd [#allocation9], 4294966656 }
  0x90   :  { %1729 = dma.done.wait [#allocation12], 4352  }
  0x91   :  { %1730 = vsyncadd [#allocation12], 4294962944 }
  0x92   :  { %1731 = dma.done.wait [#allocation15], 64  }
  0x93   :  { %1732 = vsyncadd [#allocation15], 4294967232  ;;  %v1746_v0 = vmov 1966171168   ;;  %v151_v2 = vlaneseq  ;;  %v540_v5 = vld [vmem:[#allocation13] sm:$0xff]  ;;  %v541_v6 = vld [vmem:[#allocation13 + $0x8] sm:$0xff]  ;;  %s1205_s30 = sadd.s32 %s2032_s1, %s2031_s0 }
  0x94   :  { %v149_v1 = vunpack.c.l.s4 %v1746_v0  ;;  %v542_v7 = vld [vmem:[#allocation13 + $0x10] sm:$0xff]  ;;  %v1393_v8 = vpack.c.bf16 %v541_v6, %v540_v5  ;;  %v543_v9 = vld [vmem:[#allocation13 + $0x18] sm:$0xff]  ;;  %v544_v11 = vld [vmem:[#allocation13 + $0x20] sm:$0xff]  ;;  %vm1181_vm0 = vcmask 1041409   ;;  %vm1183_vm1 = vcmask 1042434   ;;  %s1256_s17 = sshll.u32 %s1205_s30, 7 }
  0x95   :  { %v1926_v4 = vshrl.u32 %v151_v2, 7  ;;  %v1397_v10 = vpack.c.bf16 %v543_v9, %v542_v7  ;;  %v545_v12 = vld [vmem:[#allocation13 + $0x28] sm:$0xff]  ;;  %v546_v15 = vld [vmem:[#allocation13 + $0x30] sm:$0xff]  ;;  %v547_v16 = vld [vmem:[#allocation13 + $0x38] sm:$0xff]  ;;  %vm1185_vm2 = vcmask 1043459   ;;  %vm1187_vm3 = vcmask 1044484   ;;  %s1207_s22 = scalar_lea.hbm %s2040_s9, %s1256_s17 }
  0x96   :  { %v150_v3 = vunpack.c.0.s8 %v149_v1  ;;  %1394 = vmatprep.subr.bf16.mxu0 %v1393_v8  ;;  %v1401_v14 = vpack.c.bf16 %v545_v12, %v544_v11  ;;  %v144_v17 = vld [vmem:[#allocation5] sm:$0xff]  ;;  %v978_v20 = vld [vmem:[#allocation13 + $0x80] sm:$0xff]  ;;  %v979_v21 = vld [vmem:[#allocation13 + $0x88] sm:$0xff]  ;;  %v1405_v29 = vpack.c.bf16 %v547_v16, %v546_v15  ;;  %vm1189_vm4 = vcmask 1045509   ;;  %s1747_s14 = smov [#allocation17]  }
  0x97   :  { %1396 = vmatpush3.bf16.msra.mxu0 %v1393_v8  ;;  %v1933_v19 = vsub.s32 0, %v1926_v4  ;;  %v980_v22 = vld [vmem:[#allocation13 + $0x90] sm:$0xff]  ;;  %v1425_v23 = vpack.c.bf16 %v979_v21, %v978_v20  ;;  %v981_v24 = vld [vmem:[#allocation13 + $0x98] sm:$0xff]  ;;  %v982_v27 = vld [vmem:[#allocation13 + $0xa0] sm:$0xff]  ;;  %v147_v42 = vcombine.high %v144_v17, %v144_v17  ;;  %vm1191_vm5 = vcmask 1046534   ;;  %s1209_s4 = sshll.u32 %s1747_s14, 4  ;;  %s1210_s4 = int_to_ptr.vmem [resolvable:$true] %s1209_s4 }
  0x98   :  { %v1929_v13 = vsub.s32 %v150_v3, %v1926_v4  ;;  %1398 = vmatprep.subr.bf16.mxu0 %v1397_v10  ;;  %v1429_v26 = vpack.c.bf16 %v981_v24, %v980_v22  ;;  %v983_v28 = vld [vmem:[#allocation13 + $0xa8] sm:$0xff]  ;;  %v548_v31 = vld [vmem:[#allocation13 + $0x40] sm:$0xff]  ;;  %v984_v36 = vld [vmem:[#allocation13 + $0xb0] sm:$0xff]  ;;  %vm1193_vm6 = vcmask 1047559   ;;  %vm1196_vm7 = vcmask 64512   ;;  %s1701_s0 = scalar_lea.vmem %s1210_s4, 128  ;;  %p1706_p3 = scmp.lt.s32.totalorder %s1210_s4, %s1210_s4 }
  0x99   :  { %v1936_v30 = vld [vmem:[#allocation8] sm:$0xff]  ;;  %1426 = vmatprep.subr.bf16.mxu1 %v1425_v23  ;;  %v1433_v34 = vpack.c.bf16 %v983_v28, %v982_v27  ;;  %v985_v37 = vld [vmem:[#allocation13 + $0xb8] sm:$0xff]  ;;  %v550_v39 = vld [vmem:[#allocation13 + $0x50] sm:$0xff]  ;;  %p1702_p2 = scmp.ne.s32.totalorder %s1210_s4, %s1701_s0  ;;  %p1707_p4 = scmp.lt.s32.totalorder %s1701_s0, %s1701_s0 }
  0x9a   :  { %v154_v18 = vrot.slane %v144_v17, %v1929_v13  ;;  %v549_v32 = vld [vmem:[#allocation13 + $0x48] sm:$0xff]  ;;  %1428 = vmatpush3.bf16.msra.mxu1 %v1425_v23  ;;  %v551_v40 = vld [vmem:[#allocation13 + $0x58] sm:$0xff]  ;;  %v1437_v44 = vpack.c.bf16 %v985_v37, %v984_v36  ;;  %v986_v45 = vld [vmem:[#allocation13 + $0xc0] sm:$0xff]  ;;  %v161_v51 = vrot.slane %v147_v42, %v1929_v13 }
  0x9b   :  { %1400 = vmatpush3.bf16.msra.mxu0 %v1397_v10  ;;  %1430 = vmatprep.subr.bf16.mxu1 %v1429_v26  ;;  %v1409_v38 = vpack.c.bf16 %v549_v32, %v548_v31  ;;  %v987_v46 = vld [vmem:[#allocation13 + $0xc8] sm:$0xff]  ;;  %v1413_v47 = vpack.c.bf16 %v551_v40, %v550_v39  ;;  %v552_v48 = vld [vmem:[#allocation13 + $0x60] sm:$0xff]  ;;  %v988_v54 = vld [vmem:[#allocation13 + $0xd0] sm:$0xff]  ;;  %p1708_p5 = por %p1707_p4, %p1706_p3 }
  0x9c   :  { %v170_v25 = vrot.slane %v154_v18, %v1929_v13  ;;  %1402 = vmatprep.subr.bf16.mxu0 %v1401_v14  ;;  %v162_v43 = vcombine.high %v154_v18, %v154_v18  ;;  %v553_v49 = vld [vmem:[#allocation13 + $0x68] sm:$0xff]  ;;  %v1441_v52 = vpack.c.bf16 %v987_v46, %v986_v45  ;;  %v989_v55 = vld [vmem:[#allocation13 + $0xd8] sm:$0xff]  ;;  %v554_v57 = vld [vmem:[#allocation13 + $0x70] sm:$0xff]  ;;  %v163_v61 = vcombine.high %v161_v51, %v161_v51 }
  0x9d   :  { %v1417_v56 = vpack.c.bf16 %v553_v49, %v552_v48  ;;  %v555_v58 = vld [vmem:[#allocation13 + $0x78] sm:$0xff]  ;;  %v1445_v62 = vpack.c.bf16 %v989_v55, %v988_v54  ;;  %v177_v0 = vrot.slane %v161_v51, %v1929_v13  ;;  %v990_v28 = vld [vmem:[#allocation13 + $0xe0] sm:$0xff]  ;;  %v992_v32 = vld [vmem:[#allocation13 + $0xf0] sm:$0xff]  ;;  %p1709_p6 = pnand %p1708_p5, %p1702_p2 }
  0x9e   :  { %v199_v33 = vrot.slane %v170_v25, %v1933_v19  ;;  %1432 = vmatpush3.bf16.msra.mxu1 %v1429_v26  ;;  %v184_v50 = vrot.slane %v162_v43, %v1929_v13  ;;  %v192_v53 = vcombine.high %v170_v25, %v170_v25  ;;  %v1421_v1 = vpack.c.bf16 %v555_v58, %v554_v57  ;;  %v1237_v58 = vld [vmem:[#allocation16] ss:$0 sm:$0xff] }
  0x9f   :  { %1404 = vmatpush3.bf16.msra.mxu0 %v1401_v14  ;;  %1434 = vmatprep.subr.bf16.mxu1 %v1433_v34  ;;  %v191_v6 = vrot.slane %v163_v61, %v1929_v13  ;;  %v215_v8 = vrot.slane %v177_v0, %v1933_v19  ;;  %v193_v9 = vcombine.high %v177_v0, %v177_v0 }
  0xa0   :  { %v236_v35 = vsub.f32 %v199_v33, %v1936_v30  ;;  %1406 = vmatprep.subr.bf16.mxu0 %v1405_v29  ;;  %v203_v59 = vrot.slane %v184_v50, %v1933_v19  ;;  %v194_v60 = vcombine.high %v184_v50, %v184_v50  ;;  %v207_v63 = vrot.slane %v192_v53, %v1933_v19  ;;  %v993_v33 = vld [vmem:[#allocation13 + $0xf8] sm:$0xff]  ;;  %v1236_v50 = vld [vmem:[#allocation14] ss:$0 sm:$0xff] }
  0xa1   :  { %v219_v12 = vrot.slane %v191_v6, %v1933_v19  ;;  %v195_v14 = vcombine.high %v191_v6, %v191_v6  ;;  %v240_v16 = vsub.f32 %v215_v8, %v1936_v30  ;;  %v223_v17 = vrot.slane %v193_v9, %v1933_v19 }
  0xa2   :  { %v244_v41 = vmul.f32 %v236_v35, %v236_v35  ;;  %1436 = vmatpush3.bf16.msra.mxu1 %v1433_v34  ;;  %v237_v3 = vsub.f32 %v203_v59, %v1936_v30  ;;  %v211_v5 = vrot.slane %v194_v60, %v1933_v19  ;;  %v238_v7 = vsub.f32 %v207_v63, %v1936_v30  ;;  %v362_v35 = vld [vmem:[#allocation10] sm:$0xff] }
  0xa3   :  { %1408 = vmatpush3.bf16.msra.mxu0 %v1405_v29  ;;  %1438 = vmatprep.subr.bf16.mxu1 %v1437_v44  ;;  %v241_v20 = vsub.f32 %v219_v12, %v1936_v30  ;;  %v227_v21 = vrot.slane %v195_v14, %v1933_v19  ;;  %v248_v22 = vmul.f32 %v240_v16, %v240_v16  ;;  %v991_v29 = vld [vmem:[#allocation13 + $0xe8] sm:$0xff] }
  0xa4   :  { %1337 = vmatprep.mubr.f32.mxu0 %v244_v41  ;;  %1410 = vmatprep.subr.bf16.mxu0 %v1409_v38  ;;  %v245_v10 = vmul.f32 %v237_v3, %v237_v3  ;;  %v239_v11 = vsub.f32 %v211_v5, %v1936_v30  ;;  %v246_v15 = vmul.f32 %v238_v7, %v238_v7 }
  0xa5   :  { %v242_v23 = vsub.f32 %v223_v17, %v1936_v30  ;;  %v249_v24 = vmul.f32 %v241_v20, %v241_v20  ;;  %v243_v25 = vsub.f32 %v227_v21, %v1936_v30  ;;  %v1449_v31 = vpack.c.bf16 %v991_v29, %v990_v28 }
  0xa6   :  { %1440 = vmatpush3.bf16.msra.mxu1 %v1437_v44  ;;  %v247_v18 = vmul.f32 %v239_v11, %v239_v11  ;;  %v1453_v34 = vpack.c.bf16 %v993_v33, %v992_v32  ;;  %v372_v36 = vrot.slane %v362_v35, %v1929_v13  ;;  %v365_v37 = vcombine.high %v362_v35, %v362_v35  ;;  %v363_v44 = vld [vmem:[#allocation11] sm:$0xff] }
  0xa7   :  { %1412 = vmatpush3.bf16.msra.mxu0 %v1409_v38  ;;  %1442 = vmatprep.subr.bf16.mxu1 %v1441_v52  ;;  %v250_v26 = vmul.f32 %v242_v23, %v242_v23  ;;  %v251_v27 = vmul.f32 %v243_v25, %v243_v25 }
  0xa8   :  { %1414 = vmatprep.subr.bf16.mxu0 %v1413_v47  ;;  %v380_v30 = vcombine.high %v372_v36, %v372_v36  ;;  %v379_v39 = vrot.slane %v365_v37, %v1929_v13  ;;  %v388_v40 = vrot.slane %v372_v36, %v1929_v13 }
  0xaa   :  { %1444 = vmatpush3.bf16.msra.mxu1 %v1441_v52  ;;  %v402_v38 = vrot.slane %v380_v30, %v1929_v13  ;;  %v381_v43 = vcombine.high %v379_v39, %v379_v39  ;;  %v410_v45 = vcombine.high %v388_v40, %v388_v40  ;;  %v417_v46 = vrot.slane %v388_v40, %v1933_v19 }
  0xab   :  { %1416 = vmatpush3.bf16.msra.mxu0 %v1413_v47  ;;  %1446 = vmatprep.subr.bf16.mxu1 %v1445_v62  ;;  %v395_v53 = vrot.slane %v379_v39, %v1929_v13 }
  0xac   :  { %1418 = vmatprep.subr.bf16.mxu0 %v1417_v56  ;;  %v421_v41 = vrot.slane %v402_v38, %v1933_v19  ;;  %v412_v42 = vcombine.high %v402_v38, %v402_v38  ;;  %v409_v49 = vrot.slane %v381_v43, %v1929_v13  ;;  %v425_v51 = vrot.slane %v410_v45, %v1933_v19 }
  0xad   :  { %v454_v52 = vmul.f32 %v417_v46, %v363_v44  ;;  %v433_v61 = vrot.slane %v395_v53, %v1933_v19  ;;  %v255_v46 = vld [vmem:[#allocation8 + $0x8] sm:$0xff] }
  0xae   :  { %1448 = vmatpush3.bf16.msra.mxu1 %v1445_v62  ;;  %v455_v47 = vmul.f32 %v421_v41, %v363_v44  ;;  %v429_v48 = vrot.slane %v412_v42, %v1933_v19  ;;  %v413_v57 = vcombine.high %v409_v49, %v409_v49  ;;  %v456_v59 = vmul.f32 %v425_v51, %v363_v44 }
  0xaf   :  { %1420 = vmatpush3.bf16.msra.mxu0 %v1417_v56  ;;  %1450 = vmatprep.subr.bf16.mxu1 %v1449_v31  ;;  %v437_v56 = vrot.slane %v409_v49, %v1933_v19  ;;  %v469_v60 = vmul.f32 %v1236_v50, %v454_v52  ;;  %v411_v62 = vcombine.high %v395_v53, %v395_v53 }
  0xb0   :  { %1422 = vmatprep.subr.bf16.mxu0 %v1421_v1  ;;  %v470_v54 = vmul.f32 %v1236_v50, %v455_v47  ;;  %v457_v55 = vmul.f32 %v429_v48, %v363_v44  ;;  %v445_v3 = vrot.slane %v413_v57, %v1933_v19  ;;  %v471_v5 = vmul.f32 %v1236_v50, %v456_v59 }
  0xb1   :  { %v484_v6 = vadd.f32 %v1237_v58, %v469_v60  ;;  %v458_v7 = vmul.f32 %v433_v61, %v363_v44  ;;  %v441_v8 = vrot.slane %v411_v62, %v1933_v19 }
  0xb2   :  { %1452 = vmatpush3.bf16.msra.mxu1 %v1449_v31  ;;  %v485_v63 = vadd.f32 %v1237_v58, %v470_v54  ;;  %v472_v0 = vmul.f32 %v1236_v50, %v457_v55  ;;  %v461_v12 = vmul.f32 %v445_v3, %v363_v44  ;;  %v486_v14 = vadd.f32 %v1237_v58, %v471_v5 }
  0xb3   :  { %1424 = vmatpush3.bf16.msra.mxu0 %v1421_v1  ;;  %1454 = vmatprep.subr.bf16.mxu1 %v1453_v34  ;;  %v459_v1 = vmul.f32 %v437_v56, %v363_v44  ;;  %v473_v16 = vmul.f32 %v1236_v50, %v458_v7  ;;  %v460_v17 = vmul.f32 %v441_v8, %v363_v44 }
  0xb4   :  { %v1239_v9 = vmul.f32 -1.442695, %v485_v63  ;;  %v1240_v23 = vmul.f32 -1.442695, %v486_v14 }
  0xb5   :  { %v474_v11 = vmul.f32 %v1236_v50, %v459_v1  ;;  %v475_v25 = vmul.f32 %v1236_v50, %v460_v17 }
  0xb6   :  { %1338 = vmatmul.mubr.f32.vlgmr.msra.gmra.mrb[0].mxu0 %v245_v10  ;;  %1456 = vmatpush3.bf16.msra.mxu1 %v1453_v34  ;;  %v487_v10 = vadd.f32 %v1237_v58, %v472_v0  ;;  %1475 = vpow2.f32 %v1239_v9 }
  0xb7   :  { %1340 = vmatprep.mubr.f32.mxu0 %v246_v15  ;;  %v1238_v15 = vmul.f32 -1.442695, %v484_v6  ;;  %v489_v21 = vadd.f32 %v1237_v58, %v474_v11  ;;  %v490_v31 = vadd.f32 %v1237_v58, %v475_v25 }
  0xb8   :  { %v1241_v20 = vmul.f32 -1.442695, %v487_v10 }
  0xb9   :  { %1477 = vpow2.f32 %v1238_v15  ;;  %v1244_v35 = vmul.f32 -1.442695, %v490_v31 }
  0xba   :  { %1341 = vmatmul.mubr.f32.gmra.mrb[2].mxu0 %v247_v18  ;;  %v253_v18 = vld [vmem:[#allocation5 + $0x8] sm:$0xff]  ;;  %1479 = vpow2.f32 %v1241_v20 }
  0xbb   :  { %1343 = vmatprep.mubr.f32.mxu0 %v248_v22  ;;  %v476_v22 = vmul.f32 %v1236_v50, %v461_v12  ;;  %1481 = vpow2.f32 %v1240_v23  ;;  %v257_v33 = vcombine.high %v253_v18, %v253_v18 }
  0xbd   :  { %v491_v28 = vadd.f32 %v1237_v58, %v476_v22  ;;  %v271_v39 = vrot.slane %v257_v33, %v1929_v13 }
  0xbe   :  { %1344 = vmatmul.mubr.f32.gmra.mrb[4].mxu0 %v249_v24  ;;  %v488_v24 = vadd.f32 %v1237_v58, %v473_v16 }
  0xbf   :  { %1346 = vmatprep.mubr.f32.mxu0 %v250_v26  ;;  %v264_v26 = vrot.slane %v253_v18, %v1929_v13  ;;  %v1245_v34 = vmul.f32 -1.442695, %v491_v28  ;;  %v273_v49 = vcombine.high %v271_v39, %v271_v39  ;;  %v287_v60 = vrot.slane %v271_v39, %v1929_v13 }
  0xc0   :  { %v1242_v29 = vmul.f32 -1.442695, %v488_v24  ;;  %v1476_v36 = vpop.eup %1475 }
  0xc1   :  { %v272_v32 = vcombine.high %v264_v26, %v264_v26  ;;  %v280_v38 = vrot.slane %v264_v26, %v1929_v13  ;;  %v517_v40 = vadd.f32 1.0, %v1476_v36  ;;  %v301_v58 = vrot.slane %v273_v49, %v1929_v13 }
  0xc2   :  { %1347 = vmatmul.mubr.f32.gmra.mrb[6].mxu0 %v251_v27  ;;  %v1243_v27 = vmul.f32 -1.442695, %v489_v21  ;;  %v325_v8 = vrot.slane %v287_v60, %v1933_v19  ;;  %v303_v10 = vcombine.high %v287_v60, %v287_v60 }
  0xc3   :  { %v1478_v30 = vpop.eup %1477  ;;  %v294_v37 = vrot.slane %v272_v32, %v1929_v13  ;;  %v309_v47 = vrot.slane %v280_v38, %v1933_v19  ;;  %v302_v48 = vcombine.high %v280_v38, %v280_v38  ;;  %v329_v6 = vrot.slane %v301_v58, %v1933_v19 }
  0xc4   :  { %1483 = vpow2.f32 %v1243_v27  ;;  %v1480_v41 = vpop.eup %1479  ;;  %v516_v42 = vadd.f32 1.0, %v1478_v30  ;;  %v305_v7 = vcombine.high %v301_v58, %v301_v58  ;;  %v350_v24 = vsub.f32 %v325_v8, %v255_v46 }
  0xc5   :  { %1485 = vpow2.f32 %v1242_v29  ;;  %v1482_v43 = vpop.eup %1481  ;;  %v313_v44 = vrot.slane %v294_v37, %v1933_v19  ;;  %v304_v45 = vcombine.high %v294_v37, %v294_v37  ;;  %v519_v50 = vadd.f32 1.0, %v1480_v41 }
  0xc6   :  { %1487 = vpow2.f32 %v1245_v34  ;;  %v518_v52 = vadd.f32 1.0, %v1482_v43  ;;  %v346_v56 = vsub.f32 %v309_v47, %v255_v46  ;;  %v317_v57 = vrot.slane %v302_v48, %v1933_v19 }
  0xc7   :  { %1489 = vpow2.f32 %v1244_v35  ;;  %v347_v54 = vsub.f32 %v313_v44, %v255_v46  ;;  %v321_v55 = vrot.slane %v304_v45, %v1933_v19  ;;  %v351_v21 = vsub.f32 %v329_v6, %v255_v46 }
  0xc8   :  { %1491 = vrcp.f32 %v517_v40  ;;  %v354_v3 = vmul.f32 %v346_v56, %v346_v56  ;;  %v348_v5 = vsub.f32 %v317_v57, %v255_v46  ;;  %v337_v22 = vrot.slane %v305_v7, %v1933_v19 }
  0xc9   :  { %1493 = vrcp.f32 %v516_v42  ;;  %v355_v0 = vmul.f32 %v347_v54, %v347_v54  ;;  %v349_v1 = vsub.f32 %v321_v55, %v255_v46  ;;  %v333_v25 = vrot.slane %v303_v10, %v1933_v19 }
  0xca   :  { %1495 = vrcp.f32 %v519_v50  ;;  %v356_v20 = vmul.f32 %v348_v5, %v348_v5  ;;  %v359_v34 = vmul.f32 %v351_v21, %v351_v21  ;;  %v353_v35 = vsub.f32 %v337_v22, %v255_v46  ;;  %v1246_v21 = vld [vmem:[#allocation14 + $0x1] ss:$0 sm:$0xff] }
  0xcb   :  { %1497 = vrcp.f32 %v518_v52  ;;  %v357_v15 = vmul.f32 %v349_v1, %v349_v1  ;;  %v358_v37 = vmul.f32 %v350_v24, %v350_v24  ;;  %v352_v38 = vsub.f32 %v333_v25, %v255_v46 }
  0xcc   :  { %v361_v48 = vmul.f32 %v353_v35, %v353_v35 }
  0xce   :  { %v1484_v51 = vpop.eup %1483 }
  0xcf   :  { %v1486_v53 = vpop.eup %1485  ;;  %v521_v59 = vadd.f32 1.0, %v1484_v51  ;;  %v360_v51 = vmul.f32 %v352_v38, %v352_v38 }
  0xd0   :  { %v1488_v61 = vpop.eup %1487  ;;  %v520_v62 = vadd.f32 1.0, %v1486_v53 }
  0xd1   :  { %v1490_v63 = vpop.eup %1489  ;;  %1499 = vrcp.f32 %v521_v59  ;;  %v523_v9 = vadd.f32 1.0, %v1488_v61 }
  0xd2   :  { %1501 = vrcp.f32 %v520_v62  ;;  %v522_v11 = vadd.f32 1.0, %v1490_v63  ;;  %v1492_v12 = vpop.eup %1491 }
  0xd3   :  { %v1494_v16 = vpop.eup %1493  ;;  %1503 = vrcp.f32 %v523_v9 }
  0xd4   :  { %1505 = vrcp.f32 %v522_v11  ;;  %v1496_v27 = vpop.eup %1495 }
  0xd5   :  { %v1498_v31 = vpop.eup %1497 }
  0xdb   :  { %v1500_v41 = vpop.eup %1499 }
  0xdc   :  { %v1502_v44 = vpop.eup %1501 }
  0xdd   :  { %v1504_v54 = vpop.eup %1503 }
  0xde   :  { %v1506_v46 = vpop.eup %1505 }
 0x189   :  { %v1339_v14 = vpop.f32.mrb[0].mxu0 }
 0x18a   :  { %v662_v17 = vsub.f32 %v355_v0, %v1339_v14  ;;  %v622_v18 = vpop.f32.mrb[1].mxu0 }
 0x18b   :  { %v661_v23 = vsub.f32 %v354_v3, %v622_v18  ;;  %v796_v3 = vld [vmem:[#allocation10 + $0x8] sm:$0xff] }
 0x18c   :  { %v670_v26 = vmul.f32 %v1492_v12, %v662_v17  ;;  %v807_v5 = vrot.slane %v796_v3, %v1929_v13  ;;  %v800_v7 = vcombine.high %v796_v3, %v796_v3 }
 0x18d   :  { %v1342_v28 = vpop.f32.mrb[2].mxu0  ;;  %v669_v29 = vmul.f32 %v1494_v16, %v661_v23 }
 0x18e   :  { %v664_v32 = vsub.f32 %v357_v15, %v1342_v28  ;;  %v632_v33 = vpop.f32.mrb[3].mxu0  ;;  %v678_v39 = vadd.f32 %v1339_v14, %v670_v26  ;;  %v815_v6 = vcombine.high %v807_v5, %v807_v5  ;;  %v823_v9 = vrot.slane %v807_v5, %v1929_v13  ;;  %v798_v14 = vld [vmem:[#allocation11 + $0x8] sm:$0xff] }
 0x18f   :  { %v663_v36 = vsub.f32 %v356_v20, %v632_v33  ;;  %v677_v30 = vadd.f32 %v669_v29, %v622_v18  ;;  %v814_v10 = vrot.slane %v800_v7, %v1929_v13 }
 0x190   :  { %v672_v40 = vmul.f32 %v1496_v27, %v664_v32  ;;  %v837_v8 = vrot.slane %v815_v6, %v1929_v13  ;;  %v852_v15 = vrot.slane %v823_v9, %v1933_v19  ;;  %v845_v16 = vcombine.high %v823_v9, %v823_v9 }
 0x191   :  { %v671_v42 = vmul.f32 %v1498_v31, %v663_v36  ;;  %v1345_v43 = vpop.f32.mrb[4].mxu0  ;;  %1381 = vmatprep.mubr.f32.mxu1 %v677_v30  ;;  %v816_v17 = vcombine.high %v814_v10, %v814_v10  ;;  %v830_v22 = vrot.slane %v814_v10, %v1929_v13 }
 0x192   :  { %v666_v45 = vsub.f32 %v359_v34, %v1345_v43  ;;  %v642_v47 = vpop.f32.mrb[5].mxu0  ;;  %1382 = vmatmul.mubr.f32.vlgmr.msra.gmra.mrb[0].mxu1 %v678_v39  ;;  %v680_v52 = vadd.f32 %v1342_v28, %v672_v40  ;;  %v856_v11 = vrot.slane %v837_v8, %v1933_v19  ;;  %v847_v12 = vcombine.high %v837_v8, %v837_v8  ;;  %v1247_v28 = vld [vmem:[#allocation16 + $0x1] ss:$0 sm:$0xff] }
 0x193   :  { %v679_v49 = vadd.f32 %v671_v42, %v632_v33  ;;  %v665_v50 = vsub.f32 %v358_v37, %v642_v47  ;;  %v889_v23 = vmul.f32 %v852_v15, %v798_v14  ;;  %v860_v24 = vrot.slane %v845_v16, %v1933_v19 }
 0x194   :  { %v674_v53 = vmul.f32 %v1500_v41, %v666_v45  ;;  %v890_v18 = vmul.f32 %v856_v11, %v798_v14  ;;  %v864_v20 = vrot.slane %v847_v12, %v1933_v19  ;;  %v844_v25 = vrot.slane %v816_v17, %v1929_v13 }
 0x195   :  { %v673_v55 = vmul.f32 %v1502_v44, %v665_v50  ;;  %v1348_v56 = vpop.f32.mrb[6].mxu0  ;;  %1384 = vmatprep.mubr.f32.mxu1 %v679_v49  ;;  %v846_v29 = vcombine.high %v830_v22, %v830_v22  ;;  %v868_v31 = vrot.slane %v830_v22, %v1933_v19  ;;  %v905_v32 = vmul.f32 %v1246_v21, %v889_v23 }
 0x196   :  { %v668_v57 = vsub.f32 %v361_v48, %v1348_v56  ;;  %v652_v58 = vpop.f32.mrb[7].mxu0  ;;  %1385 = vmatmul.mubr.f32.gmra.mrb[2].mxu1 %v680_v52  ;;  %v682_v61 = vadd.f32 %v1345_v43, %v674_v53  ;;  %v906_v26 = vmul.f32 %v1246_v21, %v890_v18  ;;  %v892_v27 = vmul.f32 %v864_v20, %v798_v14  ;;  %v686_v53 = vld [vmem:[#allocation5 + $0x10] sm:$0xff]  ;;  %v688_v18 = vld [vmem:[#allocation8 + $0x10] sm:$0xff] }
 0x197   :  { %v681_v59 = vadd.f32 %v673_v55, %v642_v47  ;;  %v667_v60 = vsub.f32 %v360_v51, %v652_v58  ;;  %v891_v33 = vmul.f32 %v860_v24, %v798_v14  ;;  %v872_v34 = vrot.slane %v844_v25, %v1933_v19 }
 0x198   :  { %v676_v62 = vmul.f32 %v1504_v54, %v668_v57  ;;  %v848_v35 = vcombine.high %v844_v25, %v844_v25  ;;  %v922_v36 = vadd.f32 %v1247_v28, %v906_v26  ;;  %v908_v30 = vmul.f32 %v1246_v21, %v892_v27 }
 0x199   :  { %v675_v63 = vmul.f32 %v1506_v46, %v667_v60  ;;  %1387 = vmatprep.mubr.f32.mxu1 %v681_v59  ;;  %v876_v37 = vrot.slane %v846_v29, %v1933_v19  ;;  %v893_v38 = vmul.f32 %v868_v31, %v798_v14  ;;  %v921_v39 = vadd.f32 %v1247_v28, %v905_v32 }
 0x19a   :  { %1388 = vmatmul.mubr.f32.gmra.mrb[4].mxu1 %v682_v61  ;;  %v684_v1 = vadd.f32 %v1348_v56, %v676_v62  ;;  %v907_v40 = vmul.f32 %v1246_v21, %v891_v33  ;;  %v894_v41 = vmul.f32 %v872_v34, %v798_v14  ;;  %v880_v42 = vrot.slane %v848_v35, %v1933_v19 }
 0x19b   :  { %v683_v0 = vadd.f32 %v675_v63, %v652_v58  ;;  %v1249_v43 = vmul.f32 -1.442695, %v922_v36  ;;  %v924_v44 = vadd.f32 %v1247_v28, %v908_v30  ;;  %v895_v45 = vmul.f32 %v876_v37, %v798_v14 }
 0x19c   :  { %v909_v47 = vmul.f32 %v1246_v21, %v893_v38  ;;  %v1248_v48 = vmul.f32 -1.442695, %v921_v39  ;;  %v923_v49 = vadd.f32 %v1247_v28, %v907_v40  ;;  %v910_v50 = vmul.f32 %v1246_v21, %v894_v41 }
 0x19d   :  { %1390 = vmatprep.mubr.f32.mxu1 %v683_v0  ;;  %v896_v51 = vmul.f32 %v880_v42, %v798_v14  ;;  %1507 = vpow2.f32 %v1249_v43  ;;  %v1251_v52 = vmul.f32 -1.442695, %v924_v44  ;;  %v911_v54 = vmul.f32 %v1246_v21, %v895_v45 }
 0x19e   :  { %1391 = vmatmul.mubr.f32.gmra.mrb[6].mxu1 %v684_v1  ;;  %v925_v55 = vadd.f32 %v1247_v28, %v909_v47  ;;  %1509 = vpow2.f32 %v1248_v48  ;;  %v1250_v56 = vmul.f32 -1.442695, %v923_v49  ;;  %v926_v46 = vadd.f32 %v1247_v28, %v910_v50 }
 0x19f   :  { %v912_v57 = vmul.f32 %v1246_v21, %v896_v51  ;;  %v697_v58 = vrot.slane %v686_v53, %v1929_v13  ;;  %1511 = vpow2.f32 %v1251_v52  ;;  %v927_v59 = vadd.f32 %v1247_v28, %v911_v54 }
 0x1a0   :  { %v1252_v60 = vmul.f32 -1.442695, %v925_v55  ;;  %1513 = vpow2.f32 %v1250_v56  ;;  %v1253_v61 = vmul.f32 -1.442695, %v926_v46  ;;  %v690_v0 = vcombine.high %v686_v53, %v686_v53 }
 0x1a1   :  { %v928_v62 = vadd.f32 %v1247_v28, %v912_v57  ;;  %v705_v63 = vcombine.high %v697_v58, %v697_v58  ;;  %v1254_v1 = vmul.f32 -1.442695, %v927_v59  ;;  %v713_v9 = vrot.slane %v697_v58, %v1929_v13 }
 0x1a2   :  { %1515 = vpow2.f32 %v1252_v60  ;;  %v704_v8 = vrot.slane %v690_v0, %v1929_v13 }
 0x1a3   :  { %1517 = vpow2.f32 %v1253_v61  ;;  %v1255_v5 = vmul.f32 -1.442695, %v928_v62  ;;  %v727_v7 = vrot.slane %v705_v63, %v1929_v13  ;;  %v742_v20 = vrot.slane %v713_v9, %v1933_v19 }
 0x1a4   :  { %1519 = vpow2.f32 %v1254_v1  ;;  %v706_v17 = vcombine.high %v704_v8, %v704_v8  ;;  %v735_v21 = vcombine.high %v713_v9, %v713_v9  ;;  %v720_v32 = vrot.slane %v704_v8, %v1929_v13 }
 0x1a5   :  { %1521 = vpow2.f32 %v1255_v5  ;;  %v746_v15 = vrot.slane %v727_v7, %v1933_v19  ;;  %v737_v16 = vcombine.high %v727_v7, %v727_v7  ;;  %v779_v29 = vsub.f32 %v742_v20, %v688_v18 }
 0x1a6   :  { %v734_v28 = vrot.slane %v706_v17, %v1929_v13  ;;  %v750_v31 = vrot.slane %v735_v21, %v1933_v19  ;;  %v758_v42 = vrot.slane %v720_v32, %v1933_v19  ;;  %v736_v43 = vcombine.high %v720_v32, %v720_v32 }
 0x1a7   :  { %v1508_v3 = vpop.eup %1507  ;;  %v780_v26 = vsub.f32 %v746_v15, %v688_v18  ;;  %v754_v27 = vrot.slane %v737_v16, %v1933_v19  ;;  %v787_v40 = vmul.f32 %v779_v29, %v779_v29 }
 0x1a8   :  { %v1510_v6 = vpop.eup %1509  ;;  %v954_v10 = vadd.f32 1.0, %v1508_v3  ;;  %v738_v35 = vcombine.high %v734_v28, %v734_v28  ;;  %v762_v39 = vrot.slane %v734_v28, %v1933_v19  ;;  %v781_v41 = vsub.f32 %v750_v31, %v688_v18 }
 0x1a9   :  { %v1512_v11 = vpop.eup %1511  ;;  %v953_v12 = vadd.f32 1.0, %v1510_v6  ;;  %v788_v37 = vmul.f32 %v780_v26, %v780_v26  ;;  %v782_v38 = vsub.f32 %v754_v27, %v688_v18  ;;  %v783_v56 = vsub.f32 %v758_v42, %v688_v18 }
 0x1aa   :  { %v1514_v14 = vpop.eup %1513  ;;  %1523 = vrcp.f32 %v954_v10  ;;  %v956_v22 = vadd.f32 1.0, %v1512_v11  ;;  %v770_v47 = vrot.slane %v738_v35, %v1933_v19  ;;  %v784_v52 = vsub.f32 %v762_v39, %v688_v18 }
 0x1ab   :  { %1525 = vrcp.f32 %v953_v12  ;;  %v955_v24 = vadd.f32 1.0, %v1514_v14  ;;  %v790_v51 = vmul.f32 %v782_v38, %v782_v38  ;;  %v789_v55 = vmul.f32 %v781_v41, %v781_v41 }
 0x1ac   :  { %v1516_v23 = vpop.eup %1515  ;;  %1527 = vrcp.f32 %v956_v22  ;;  %v766_v46 = vrot.slane %v736_v43, %v1933_v19  ;;  %v786_v60 = vsub.f32 %v770_v47, %v688_v18  ;;  %v792_v0 = vmul.f32 %v784_v52, %v784_v52 }
 0x1ad   :  { %v1518_v25 = vpop.eup %1517  ;;  %v957_v33 = vadd.f32 1.0, %v1516_v23  ;;  %1529 = vrcp.f32 %v955_v24  ;;  %v791_v6 = vmul.f32 %v783_v56, %v783_v56 }
 0x1ae   :  { %v1520_v34 = vpop.eup %1519  ;;  %v958_v36 = vadd.f32 1.0, %v1518_v25  ;;  %v785_v7 = vsub.f32 %v766_v46, %v688_v18  ;;  %v794_v10 = vmul.f32 %v786_v60, %v786_v60 }
 0x1af   :  { %v1522_v30 = vpop.eup %1521  ;;  %v959_v44 = vadd.f32 1.0, %v1520_v34  ;;  %1531 = vrcp.f32 %v957_v33 }
 0x1b0   :  { %1533 = vrcp.f32 %v958_v36  ;;  %v960_v48 = vadd.f32 1.0, %v1522_v30  ;;  %v793_v21 = vmul.f32 %v785_v7, %v785_v7  ;;  %v1148_v30 = vand.u32 127, %v151_v2 }
 0x1b1   :  { %1535 = vrcp.f32 %v959_v44 }
 0x1b2   :  { %1537 = vrcp.f32 %v960_v48  ;;  %v1151_v38 = vsub.s32 %v1148_v30, %v1926_v4 }
 0x1b4   :  { %v1524_v45 = vpop.eup %1523 }
 0x1b5   :  { %v1526_v53 = vpop.eup %1525 }
 0x1b6   :  { %v1528_v58 = vpop.eup %1527 }
 0x1b7   :  { %v1530_v3 = vpop.eup %1529 }
 0x1b9   :  { %v1532_v19 = vpop.eup %1531 }
 0x1ba   :  { %v1534_v17 = vpop.eup %1533 }
 0x1bb   :  { %v1536_v24 = vpop.eup %1535 }
 0x1bc   :  { %v1538_v28 = vpop.eup %1537 }
 0x265   :  { %v1383_v13 = vpop.f32.mrb[0].mxu1 }
 0x266   :  { %v1100_v49 = vsub.f32 %v788_v37, %v1383_v13  ;;  %v1060_v50 = vpop.f32.mrb[1].mxu1 }
 0x267   :  { %v1099_v54 = vsub.f32 %v787_v40, %v1060_v50 }
 0x268   :  { %v1108_v57 = vmul.f32 %v1524_v45, %v1100_v49 }
 0x269   :  { %v1386_v59 = vpop.f32.mrb[2].mxu1  ;;  %v1107_v1 = vmul.f32 %v1526_v53, %v1099_v54 }
 0x26a   :  { %v1102_v61 = vsub.f32 %v790_v51, %v1386_v59  ;;  %v1070_v62 = vpop.f32.mrb[3].mxu1  ;;  %v1116_v63 = vadd.f32 %v1383_v13, %v1108_v57 }
 0x26b   :  { %v1101_v5 = vsub.f32 %v789_v55, %v1070_v62  ;;  %v1115_v14 = vadd.f32 %v1107_v1, %v1060_v50 }
 0x26c   :  { %1125 = vadd.xlane.f32.xlu0 %v1116_v63  ;;  %v1110_v8 = vmul.f32 %v1528_v58, %v1102_v61 }
 0x26d   :  { %v1389_v9 = vpop.f32.mrb[4].mxu1  ;;  %v1109_v16 = vmul.f32 %v1530_v3, %v1101_v5 }
 0x26e   :  { %v1104_v11 = vsub.f32 %v792_v0, %v1389_v9  ;;  %v1080_v12 = vpop.f32.mrb[5].mxu1  ;;  %v1118_v15 = vadd.f32 %v1386_v59, %v1110_v8 }
 0x26f   :  { %v1103_v20 = vsub.f32 %v791_v6, %v1080_v12  ;;  %v1117_v26 = vadd.f32 %v1109_v16, %v1070_v62 }
 0x270   :  { %1123 = vadd.xlane.f32.xlu0 %v1115_v14  ;;  %1129 = vadd.xlane.f32.xlu1 %v1118_v15  ;;  %v1112_v27 = vmul.f32 %v1534_v17, %v1104_v11 }
 0x271   :  { %v1392_v22 = vpop.f32.mrb[6].mxu1  ;;  %v1111_v23 = vmul.f32 %v1532_v19, %v1103_v20 }
 0x272   :  { %v1106_v25 = vsub.f32 %v794_v10, %v1392_v22  ;;  %v1090_v18 = vpop.f32.mrb[7].mxu1  ;;  %v1120_v33 = vadd.f32 %v1389_v9, %v1112_v27 }
 0x273   :  { %v1105_v29 = vsub.f32 %v793_v21, %v1090_v18  ;;  %v1119_v31 = vadd.f32 %v1111_v23, %v1080_v12 }
 0x274   :  { %1127 = vadd.xlane.f32.xlu1 %v1117_v26  ;;  %v1114_v34 = vmul.f32 %v1538_v28, %v1106_v25 }
 0x275   :  { %v1113_v32 = vmul.f32 %v1536_v24, %v1105_v29  ;;  %1131 = vadd.xlane.f32.xlu0 %v1119_v31 }
 0x276   :  { %v1122_v36 = vadd.f32 %v1392_v22, %v1114_v34 }
 0x277   :  { %v1121_v35 = vadd.f32 %v1113_v32, %v1090_v18 }
 0x278   :  { %1133 = vadd.xlane.f32.xlu1 %v1120_v33 }
 0x279   :  { %1135 = vadd.xlane.f32.xlu0 %v1121_v35 }
 0x27c   :  { %1137 = vadd.xlane.f32.xlu1 %v1122_v36 }
 0x2f9   :  { %v1126_v37 = vpop.xlane.xlu0 %1125 }
 0x2fa   :  { %v1156_v42 = vrot.slane %v1126_v37, %v1151_v38 }
 0x2fd   :  { %v1124_v39 = vpop.xlane.xlu0 %1123  ;;  %v1130_v40 = vpop.xlane.xlu1 %1129 }
 0x2fe   :  { %v1152_v41 = vrot.slane %v1124_v39, %v1151_v38  ;;  %v1164_v47 = vrot.slane %v1130_v40, %v1151_v38 }
 0x300   :  { %v1182_v13 = vsel %vm1181_vm0, %v1156_v42, %v1152_v41 }
 0x301   :  { %v1128_v43 = vpop.xlane.xlu1 %1127 }
 0x302   :  { %v1160_v44 = vrot.slane %v1128_v43, %v1151_v38  ;;  %v1132_v45 = vpop.xlane.xlu0 %1131 }
 0x303   :  { %v1168_v48 = vrot.slane %v1132_v45, %v1151_v38 }
 0x304   :  { %v1184_v49 = vsel %vm1183_vm1, %v1160_v44, %v1182_v13 }
 0x305   :  { %v1186_v50 = vsel %vm1185_vm2, %v1164_v47, %v1184_v49  ;;  %v1134_v2 = vpop.xlane.xlu1 %1133 }
 0x306   :  { %v1188_v4 = vsel %vm1187_vm3, %v1168_v48, %v1186_v50  ;;  %v1172_v51 = vrot.slane %v1134_v2, %v1151_v38  ;;  %v1136_v52 = vpop.xlane.xlu0 %1135 }
 0x307   :  { %v1176_v53 = vrot.slane %v1136_v52, %v1151_v38 }
 0x308   :  { %v1190_v54 = vsel %vm1189_vm4, %v1172_v51, %v1188_v4 }
 0x309   :  { %v1138_v55 = vpop.xlane.xlu1 %1137  ;;  %v1192_v46 = vsel %vm1191_vm5, %v1176_v53, %v1190_v54 }
 0x30a   :  { %v1180_v56 = vrot.slane %v1138_v55, %v1151_v38 }
 0x30c   :  { %v1194_v57 = vsel %vm1193_vm6, %v1180_v56, %v1192_v46 }
 0x30d   :  { %1197 = vst.msk [vmem:[#allocation17] sm:$0xff] %vm1196_vm7, %v1194_v57 }
 0x30e   :  { %1712 = shalt.err (!%p1709_p6)
}
 0x30f   :  { %s1713_s1 = scalar_lea.hbm %s1207_s22, 128  ;;  %s1715_s23 = scalar_lea.hbm %s2040_s9, 128 }
 0x310   :  { %p1714_p7 = scmp.ne.s32.totalorder %s1207_s22, %s1713_s1  ;;  %p1716_p8 = scmp.lt.u32.totalorder %s1207_s22, %s2040_s9 }
 0x311   :  { %p1717_p9 = scmp.lt.u32.totalorder %s1715_s23, %s1713_s1  ;;  %p1719_p11 = scmp.lt.u32.totalorder %s1713_s1, %s1207_s22 }
 0x313   :  { %p1718_p10 = por %p1717_p9, %p1716_p8 }
 0x315   :  { %p1720_p12 = por %p1719_p11, %p1718_p10 }
 0x317   :  { %p1721_p13 = pnand %p1720_p12, %p1714_p7 }
 0x319   :  { %1724 = shalt.err (!%p1721_p13)
}
 0x31a   :  { %1212 = dma.vmem_to_hbm [thread:$0]  %s1210_s4, 128, %s1207_s22, [#allocation7]  }
 0x31b   :  { %1733 = dma.done.wait [#allocation7], 128  }
 0x31c   :  { %1734 = vsyncadd [#allocation7], 4294967168 }
 0x31d   :  { %1216 = vsyncpa [#allocation6], 1 }
 0x31e   :  { %1217 = vsyncpa [#allocation9], 1 }
 0x31f   :  { %1218 = vsyncpa [#allocation12], 1 }
 0x320   :  { %1219 = vsyncpa [#allocation15], 1 }
 0x321   :  { %1220 = vsyncpa [#allocation7], 1 }

</bundles_post_ra>
